<compile_context>
chip_gen: v5e
topology: v5e:2x2
jax: 0.10.0
libtpu: 0.0.40
codegen_flags: <defaults>
</compile_context>

<pallas_src>
import functools

import jax
import jax.numpy as jnp
from jax.experimental import pallas as pl
from jax.experimental.pallas import tpu as pltpu


def _round_up(x, m):
    return ((x + m - 1) // m) * m


def _mlp_kernel(x_ref, w_ref, b_ref, out_ref):
    """One batch tile through the whole zero-padded MLP.

    x_ref:   (TB, PAD)      f32  - batch tile, feature dim zero-padded
    w_ref:   (L, PAD, PAD)  bf16 - all layer weights (zero-padded), VMEM-resident
    b_ref:   (L, 1, PAD)    f32  - all layer biases (zero-padded), VMEM-resident
    out_ref: (TB, PAD)      f32  - lane-dense output tile (real outputs in [:, :n_output])
    """
    n_layers_total = w_ref.shape[0]
    h = x_ref[...]                                      # f32 (TB, PAD)
    # Fully unrolled layer loop: next layer's weight slice loads overlap the
    # current layer's MXU work.
    for i in range(n_layers_total):
        acc = jnp.dot(h.astype(jnp.bfloat16), w_ref[i],
                      preferred_element_type=jnp.float32)   # MXU: bf16 in, f32 acc
        h = jnp.maximum(acc + b_ref[i], 0.0)                # VPU bias + ReLU in f32
    out_ref[...] = h


def riskfuel_forward(x, params, *, block_batch=512):
    """x: (batch, n_feature) f32; params: list of (W (in,out), b (out,)) f32."""
    batch, n_feature = x.shape
    n_output = params[-1][0].shape[1]
    L = len(params)

    # Common lane-aligned width for every layer so all weights stack into one
    # operand and every matmul is a full-width MXU pass.
    dims = [n_feature] + [w.shape[1] for w, _ in params]
    PAD = max(_round_up(d, 128) for d in dims)

    # Pack + zero-pad weights (bf16 for the MXU) and biases (f32).
    w_stack = jnp.zeros((L, PAD, PAD), jnp.bfloat16)
    b_stack = jnp.zeros((L, 1, PAD), jnp.float32)
    for i, (w, b) in enumerate(params):
        fi, fo = w.shape
        w_stack = w_stack.at[i, :fi, :fo].set(w.astype(jnp.bfloat16))
        b_stack = b_stack.at[i, 0, :fo].set(b.reshape(-1).astype(jnp.float32))

    # Batch tiling: large tiles amortize per-step overhead; TB multiple of 8.
    TB = min(block_batch, _round_up(batch, 8))
    batch_pad = _round_up(batch, TB)
    x_pad = jnp.zeros((batch_pad, PAD), jnp.float32)
    x_pad = x_pad.at[:batch, :n_feature].set(x.astype(jnp.float32))

    grid = (batch_pad // TB,)
    flops = 2 * batch_pad * L * PAD * PAD
    bytes_accessed = (x_pad.size * 4 + w_stack.size * 2 + b_stack.size * 4
                      + batch_pad * PAD * 4)

    out_pad = pl.pallas_call(
        _mlp_kernel,
        out_shape=jax.ShapeDtypeStruct((batch_pad, PAD), jnp.float32),
        grid_spec=pltpu.PrefetchScalarGridSpec(
            num_scalar_prefetch=0,
            grid=grid,
            in_specs=[
                pl.BlockSpec((TB, PAD), lambda i: (i, 0)),        # x: pipelined tiles
                pl.BlockSpec((L, PAD, PAD), lambda i: (0, 0, 0)),  # weights: resident
                pl.BlockSpec((L, 1, PAD), lambda i: (0, 0, 0)),    # biases: resident
            ],
            out_specs=pl.BlockSpec((TB, PAD), lambda i: (i, 0)),   # lane-dense output
        ),
        compiler_params=pltpu.CompilerParams(
            dimension_semantics=("parallel",),   # shard batch tiles across v7x's 2 TCs
        ),
        cost_estimate=pl.CostEstimate(
            flops=flops, transcendentals=0, bytes_accessed=bytes_accessed),
    )(x_pad, w_stack, b_stack)

    return out_pad[:batch, :n_output]


def init_riskfuel_params(key, n_feature, n_hidden, n_layers, n_output):
    """torch.nn.Linear-style init: U(-k, k), k = 1/sqrt(fan_in).

    Layer structure matches RiskFuelNet.__init__: Linear(n_feature, n_hidden),
    (n_layers - 1) x Linear(n_hidden, n_hidden), Linear(n_hidden, n_output).
    """
    dims = [(n_feature, n_hidden)]
    dims += [(n_hidden, n_hidden) for _ in range(1, n_layers)]
    dims += [(n_hidden, n_output)]

    params = []
    for (fan_in, fan_out) in dims:
        key, kw, kb = jax.random.split(key, 3)
        bound = 1.0 / (fan_in ** 0.5)
        w = jax.random.uniform(kw, (fan_in, fan_out), jnp.float32, -bound, bound)
        b = jax.random.uniform(kb, (fan_out,), jnp.float32, -bound, bound)
        params.append((w, b))
    return params


def riskfuel_reference(x, params):
    """Plain-JAX f32 reference of the PyTorch forward (ReLU after every layer)."""
    h = x
    for w, b in params:
        h = jnp.maximum(jnp.dot(h, w) + b.reshape(1, -1), 0.0)
    return h


if __name__ == "__main__":
    # Small shapes consistent with the module's forward (batch of feature rows).
    batch, n_feature, n_hidden, n_layers, n_output = 8, 4, 32, 3, 1

    key = jax.random.PRNGKey(0)
    key, kx = jax.random.split(key)
    x = jax.random.normal(kx, (batch, n_feature), jnp.float32)

    params = init_riskfuel_params(key, n_feature, n_hidden, n_layers, n_output)

    fwd = jax.jit(functools.partial(riskfuel_forward))
    out = jax.block_until_ready(fwd(x, params))

    ref = riskfuel_reference(x, params)
    assert out.shape == (batch, n_output), out.shape
    # bf16 MXU operands (f32 accumulate) -> compare to the f32 reference with a
    # correspondingly looser tolerance.
    assert jnp.allclose(out, ref, atol=3e-2, rtol=3e-2), (out, ref)

    print("KERNEL_OK")
</pallas_src>

<mosaic_0001>
module attributes {stable_mosaic.version = 11 : i64} {
  func.func @_mlp_kernel(%arg0: i32, %arg1: memref<8x128xf32, #tpu.memory_space<vmem>>, %arg2: memref<4x128x128xbf16, #tpu.memory_space<vmem>>, %arg3: memref<4x1x128xf32, #tpu.memory_space<vmem>>, %arg4: memref<8x128xf32, #tpu.memory_space<vmem>>) attributes {dimension_semantics = [#tpu.dimension_semantics<parallel>], iteration_bounds = array<i64: 1>, scalar_prefetch = 0 : i64, scratch_operands = 0 : i64, tpu.core_type = #tpu.core_type<tc>, window_params = [{transform_indices = @transform_0, window_bounds = array<i64: 8, 128>}, {pipeline_mode = #tpu.pipeline_mode<synchronous>, transform_indices = @transform_1, window_bounds = array<i64: 4, 128, 128>}, {pipeline_mode = #tpu.pipeline_mode<synchronous>, transform_indices = @transform_2, window_bounds = array<i64: 4, 1, 128>}, {transform_indices = @transform_3, window_bounds = array<i64: 8, 128>}]} {
    %c0 = arith.constant 0 : index
    %c0_0 = arith.constant 0 : index
    %0 = vector.load %arg1[%c0, %c0_0] : memref<8x128xf32, #tpu.memory_space<vmem>>, vector<8x128xf32>
    %1 = arith.truncf %0 : vector<8x128xf32> to vector<8x128xbf16>
    %c0_1 = arith.constant 0 : index
    %c0_2 = arith.constant 0 : index
    %c0_3 = arith.constant 0 : index
    %2 = vector.load %arg2[%c0_1, %c0_2, %c0_3] : memref<4x128x128xbf16, #tpu.memory_space<vmem>>, vector<1x128x128xbf16>
    %3 = vector.shape_cast %2 : vector<1x128x128xbf16> to vector<128x128xbf16>
    %cst = arith.constant dense<0.000000e+00> : vector<8x128xf32>
    %4 = tpu.matmul %1, %3, %cst {dimension_numbers = #tpu.dot_dimension_numbers<[1], [0], [0], [1], [0, 0, 1, 1], [], []>} : vector<8x128xbf16>, vector<128x128xbf16>, vector<8x128xf32> -> vector<8x128xf32>
    %c0_4 = arith.constant 0 : index
    %c0_5 = arith.constant 0 : index
    %c0_6 = arith.constant 0 : index
    %5 = vector.load %arg3[%c0_4, %c0_5, %c0_6] : memref<4x1x128xf32, #tpu.memory_space<vmem>>, vector<1x1x128xf32>
    %6 = vector.shape_cast %5 : vector<1x1x128xf32> to vector<1x128xf32>
    %7 = vector.broadcast %6 : vector<1x128xf32> to vector<8x128xf32>
    %8 = arith.addf %4, %7 : vector<8x128xf32>
    %cst_7 = arith.constant 0.000000e+00 : f32
    %9 = vector.broadcast %cst_7 : f32 to vector<8x128xf32>
    %10 = arith.maximumf %8, %9 : vector<8x128xf32>
    %11 = arith.truncf %10 : vector<8x128xf32> to vector<8x128xbf16>
    %c1 = arith.constant 1 : index
    %c0_8 = arith.constant 0 : index
    %c0_9 = arith.constant 0 : index
    %12 = vector.load %arg2[%c1, %c0_8, %c0_9] : memref<4x128x128xbf16, #tpu.memory_space<vmem>>, vector<1x128x128xbf16>
    %13 = vector.shape_cast %12 : vector<1x128x128xbf16> to vector<128x128xbf16>
    %cst_10 = arith.constant dense<0.000000e+00> : vector<8x128xf32>
    %14 = tpu.matmul %11, %13, %cst_10 {dimension_numbers = #tpu.dot_dimension_numbers<[1], [0], [0], [1], [0, 0, 1, 1], [], []>} : vector<8x128xbf16>, vector<128x128xbf16>, vector<8x128xf32> -> vector<8x128xf32>
    %c1_11 = arith.constant 1 : index
    %c0_12 = arith.constant 0 : index
    %c0_13 = arith.constant 0 : index
    %15 = vector.load %arg3[%c1_11, %c0_12, %c0_13] : memref<4x1x128xf32, #tpu.memory_space<vmem>>, vector<1x1x128xf32>
    %16 = vector.shape_cast %15 : vector<1x1x128xf32> to vector<1x128xf32>
    %17 = vector.broadcast %16 : vector<1x128xf32> to vector<8x128xf32>
    %18 = arith.addf %14, %17 : vector<8x128xf32>
    %cst_14 = arith.constant 0.000000e+00 : f32
    %19 = vector.broadcast %cst_14 : f32 to vector<8x128xf32>
    %20 = arith.maximumf %18, %19 : vector<8x128xf32>
    %21 = arith.truncf %20 : vector<8x128xf32> to vector<8x128xbf16>
    %c2 = arith.constant 2 : index
    %c0_15 = arith.constant 0 : index
    %c0_16 = arith.constant 0 : index
    %22 = vector.load %arg2[%c2, %c0_15, %c0_16] : memref<4x128x128xbf16, #tpu.memory_space<vmem>>, vector<1x128x128xbf16>
    %23 = vector.shape_cast %22 : vector<1x128x128xbf16> to vector<128x128xbf16>
    %cst_17 = arith.constant dense<0.000000e+00> : vector<8x128xf32>
    %24 = tpu.matmul %21, %23, %cst_17 {dimension_numbers = #tpu.dot_dimension_numbers<[1], [0], [0], [1], [0, 0, 1, 1], [], []>} : vector<8x128xbf16>, vector<128x128xbf16>, vector<8x128xf32> -> vector<8x128xf32>
    %c2_18 = arith.constant 2 : index
    %c0_19 = arith.constant 0 : index
    %c0_20 = arith.constant 0 : index
    %25 = vector.load %arg3[%c2_18, %c0_19, %c0_20] : memref<4x1x128xf32, #tpu.memory_space<vmem>>, vector<1x1x128xf32>
    %26 = vector.shape_cast %25 : vector<1x1x128xf32> to vector<1x128xf32>
    %27 = vector.broadcast %26 : vector<1x128xf32> to vector<8x128xf32>
    %28 = arith.addf %24, %27 : vector<8x128xf32>
    %cst_21 = arith.constant 0.000000e+00 : f32
    %29 = vector.broadcast %cst_21 : f32 to vector<8x128xf32>
    %30 = arith.maximumf %28, %29 : vector<8x128xf32>
    %31 = arith.truncf %30 : vector<8x128xf32> to vector<8x128xbf16>
    %c3 = arith.constant 3 : index
    %c0_22 = arith.constant 0 : index
    %c0_23 = arith.constant 0 : index
    %32 = vector.load %arg2[%c3, %c0_22, %c0_23] : memref<4x128x128xbf16, #tpu.memory_space<vmem>>, vector<1x128x128xbf16>
    %33 = vector.shape_cast %32 : vector<1x128x128xbf16> to vector<128x128xbf16>
    %cst_24 = arith.constant dense<0.000000e+00> : vector<8x128xf32>
    %34 = tpu.matmul %31, %33, %cst_24 {dimension_numbers = #tpu.dot_dimension_numbers<[1], [0], [0], [1], [0, 0, 1, 1], [], []>} : vector<8x128xbf16>, vector<128x128xbf16>, vector<8x128xf32> -> vector<8x128xf32>
    %c3_25 = arith.constant 3 : index
    %c0_26 = arith.constant 0 : index
    %c0_27 = arith.constant 0 : index
    %35 = vector.load %arg3[%c3_25, %c0_26, %c0_27] : memref<4x1x128xf32, #tpu.memory_space<vmem>>, vector<1x1x128xf32>
    %36 = vector.shape_cast %35 : vector<1x1x128xf32> to vector<1x128xf32>
    %37 = vector.broadcast %36 : vector<1x128xf32> to vector<8x128xf32>
    %38 = arith.addf %34, %37 : vector<8x128xf32>
    %cst_28 = arith.constant 0.000000e+00 : f32
    %39 = vector.broadcast %cst_28 : f32 to vector<8x128xf32>
    %40 = arith.maximumf %38, %39 : vector<8x128xf32>
    %c0_29 = arith.constant 0 : index
    %c0_30 = arith.constant 0 : index
    %41 = vector.load %arg4[%c0_29, %c0_30] : memref<8x128xf32, #tpu.memory_space<vmem>>, vector<8x128xf32>
    tpu.vector_store %arg4[%c0_29, %c0_30], %40 {strides = array<i32>} : memref<8x128xf32, #tpu.memory_space<vmem>>, vector<8x128xf32>,
    return
  }
  func.func @transform_0(%arg0: i32) -> (i32, i32) {
    %c0_i32 = arith.constant 0 : i32
    %c0_i32_0 = arith.constant 0 : i32
    return %arg0, %c0_i32 : i32, i32
  }
  func.func @transform_1(%arg0: i32) -> (i32, i32, i32) {
    %c0_i32 = arith.constant 0 : i32
    %c0_i32_0 = arith.constant 0 : i32
    %c0_i32_1 = arith.constant 0 : i32
    %c0_i32_2 = arith.constant 0 : i32
    return %c0_i32, %c0_i32_0, %c0_i32_1 : i32, i32, i32
  }
  func.func @transform_2(%arg0: i32) -> (i32, i32, i32) {
    %c0_i32 = arith.constant 0 : i32
    %c0_i32_0 = arith.constant 0 : i32
    %c0_i32_1 = arith.constant 0 : i32
    %c0_i32_2 = arith.constant 0 : i32
    return %c0_i32, %c0_i32_0, %c0_i32_1 : i32, i32, i32
  }
  func.func @transform_3(%arg0: i32) -> (i32, i32) {
    %c0_i32 = arith.constant 0 : i32
    %c0_i32_0 = arith.constant 0 : i32
    return %arg0, %c0_i32 : i32, i32
  }
}

</mosaic_0001>

<bundles_post_ra>
// kernel: riskfuel_forward.1
= control target key start
LH: loop header
LB: loop body
LE: loop exit
PB: predicated region body
PF: predicated region fallthrough
CT: control target
= control target key end

     0   :  { %s707_s1 = inlined_call_operand.vmem [shape: bf16[4,128,128], index: 1, kind: input, shape index: {}]   ;;  %s708_s2 = inlined_call_operand.vmem [shape: f32[4,1,128], index: 2, kind: input, shape index: {}]   ;;  %s709_s0 = inlined_call_operand.vmem [shape: f32[8,128], index: 0, kind: input, shape index: {}]   ;;  %s710_s3 = inlined_call_operand.vmem [shape: f32[8,128], index: 3, kind: output, shape index: {}]  }
   0x1   :  { %v544_v0 = vld [vmem:[%s707_s1 + $0x38] sm:$0xff]  ;;  %v543_v1 = vld [vmem:[%s707_s1 + $0x30] sm:$0xff]  ;;  %v542_v4 = vld [vmem:[%s707_s1 + $0x28] sm:$0xff] }
   0x2   :  { %84 = vmatpush.bf16.msra.mxu0 %v544_v0  ;;  %v552_v2 = vld [vmem:[%s707_s1 + $0x78] sm:$0xff]  ;;  %v551_v3 = vld [vmem:[%s707_s1 + $0x70] sm:$0xff]  ;;  %v550_v5 = vld [vmem:[%s707_s1 + $0x68] sm:$0xff] }
   0x3   :  { %169 = vmatpush.bf16.msra.mxu1 %v552_v2  ;;  %v541_v6 = vld [vmem:[%s707_s1 + $0x20] sm:$0xff]  ;;  %v540_v8 = vld [vmem:[%s707_s1 + $0x18] sm:$0xff]  ;;  %v539_v10 = vld [vmem:[%s707_s1 + $0x10] sm:$0xff] }
   0x4   :  { %v549_v7 = vld [vmem:[%s707_s1 + $0x60] sm:$0xff]  ;;  %v548_v9 = vld [vmem:[%s707_s1 + $0x58] sm:$0xff]  ;;  %v547_v11 = vld [vmem:[%s707_s1 + $0x50] sm:$0xff] }
   0x5   :  { %v538_v12 = vld [vmem:[%s707_s1 + $0x8] sm:$0xff]  ;;  %v537_v13 = vld [vmem:[%s707_s1] sm:$0xff]  ;;  %v560_v18 = vld [vmem:[%s707_s1 + $0xb8] sm:$0xff] }
   0x6   :  { %85 = vmatpush.bf16.msra.mxu0 %v543_v1  ;;  %v14_v14 = vld [vmem:[%s709_s0] sm:$0xff]  ;;  %v546_v16 = vld [vmem:[%s707_s1 + $0x48] sm:$0xff]  ;;  %254 = vmatpush.bf16.msra.mxu2 %v560_v18  ;;  %v559_v19 = vld [vmem:[%s707_s1 + $0xb0] sm:$0xff] }
   0x7   :  { %170 = vmatpush.bf16.msra.mxu1 %v551_v3  ;;  %v15_v15 = vpack.c.bf16 %v14_v14, %v14_v14  ;;  %v545_v17 = vld [vmem:[%s707_s1 + $0x40] sm:$0xff]  ;;  %v558_v20 = vld [vmem:[%s707_s1 + $0xa8] sm:$0xff]  ;;  %v556_v22 = vld [vmem:[%s707_s1 + $0x98] sm:$0xff] }
   0x8   :  { %v557_v21 = vld [vmem:[%s707_s1 + $0xa0] sm:$0xff]  ;;  %v555_v23 = vld [vmem:[%s707_s1 + $0x90] sm:$0xff]  ;;  %v554_v30 = vld [vmem:[%s707_s1 + $0x88] sm:$0xff] }
   0x9   :  { %v569_v24 = vld [vmem:[%s708_s2] ss:$0 sm:$0xff]  ;;  %v568_v32 = vld [vmem:[%s707_s1 + $0xf8] sm:$0xff]  ;;  %v567_v33 = vld [vmem:[%s707_s1 + $0xf0] sm:$0xff] }
   0xa   :  { %86 = vmatpush.bf16.msra.mxu0 %v542_v4  ;;  %255 = vmatpush.bf16.msra.mxu2 %v559_v19  ;;  %v553_v31 = vld [vmem:[%s707_s1 + $0x80] sm:$0xff]  ;;  %v566_v34 = vld [vmem:[%s707_s1 + $0xe8] sm:$0xff]  ;;  %v564_v36 = vld [vmem:[%s707_s1 + $0xd8] sm:$0xff] }
   0xb   :  { %171 = vmatpush.bf16.msra.mxu1 %v550_v5  ;;  %339 = vmatpush.bf16.msra.mxu3 %v568_v32  ;;  %v565_v35 = vld [vmem:[%s707_s1 + $0xe0] sm:$0xff]  ;;  %v563_v37 = vld [vmem:[%s707_s1 + $0xd0] sm:$0xff]  ;;  %v562_v44 = vld [vmem:[%s707_s1 + $0xc8] sm:$0xff] }
   0xc   :  { %v570_v38 = vld [vmem:[%s708_s2 + $0x1] ss:$0 sm:$0xff]  ;;  %v571_v46 = vld [vmem:[%s708_s2 + $0x2] ss:$0 sm:$0xff]  ;;  %v572_v52 = vld [vmem:[%s708_s2 + $0x3] ss:$0 sm:$0xff] }
   0xd   :  { %v561_v45 = vld [vmem:[%s707_s1 + $0xc0] sm:$0xff] }
   0xe   :  { %87 = vmatpush.bf16.msra.mxu0 %v541_v6  ;;  %256 = vmatpush.bf16.msra.mxu2 %v558_v20 }
   0xf   :  { %172 = vmatpush.bf16.msra.mxu1 %v549_v7  ;;  %340 = vmatpush.bf16.msra.mxu3 %v567_v33 }
  0x12   :  { %88 = vmatpush.bf16.msra.mxu0 %v540_v8  ;;  %257 = vmatpush.bf16.msra.mxu2 %v557_v21 }
  0x13   :  { %173 = vmatpush.bf16.msra.mxu1 %v548_v9  ;;  %341 = vmatpush.bf16.msra.mxu3 %v566_v34 }
  0x16   :  { %89 = vmatpush.bf16.msra.mxu0 %v539_v10  ;;  %258 = vmatpush.bf16.msra.mxu2 %v556_v22 }
  0x17   :  { %174 = vmatpush.bf16.msra.mxu1 %v547_v11  ;;  %342 = vmatpush.bf16.msra.mxu3 %v565_v35 }
  0x1a   :  { %90 = vmatpush.bf16.msra.mxu0 %v538_v12  ;;  %259 = vmatpush.bf16.msra.mxu2 %v555_v23 }
  0x1b   :  { %175 = vmatpush.bf16.msra.mxu1 %v546_v16  ;;  %343 = vmatpush.bf16.msra.mxu3 %v564_v36 }
  0x1e   :  { %91 = vmatpush.bf16.msra.mxu0 %v537_v13  ;;  %260 = vmatpush.bf16.msra.mxu2 %v554_v30 }
  0x1f   :  { %176 = vmatpush.bf16.msra.mxu1 %v545_v17  ;;  %344 = vmatpush.bf16.msra.mxu3 %v563_v37 }
  0x21   :  { %92 = vmatmul.bf16.vlgmr.msra.gmra.mxu0 %v15_v15 }
  0x22   :  { %261 = vmatpush.bf16.msra.mxu2 %v553_v31 }
  0x23   :  { %345 = vmatpush.bf16.msra.mxu3 %v562_v44 }
  0x27   :  { %346 = vmatpush.bf16.msra.mxu3 %v561_v45 }
  0x9e   :  { %v93_v25 = vpop.f32.mrf.mxu0 }
  0x9f   :  { %v94_v26 = vadd.f32 %v569_v24, %v93_v25 }
  0xa1   :  { %v97_v27 = vmax.f32 %v94_v26, 0.0 }
  0xa3   :  { %v98_v28 = vpack.c.bf16 %v97_v27, %v97_v27 }
  0xa5   :  { %177 = vmatmul.bf16.vlgmr.msra.gmra.mxu1 %v98_v28 }
  0xa6   :  { %v95_v29 = vpop.f32.mrf.mxu0 }
 0x122   :  { %v178_v39 = vpop.f32.mrf.mxu1 }
 0x123   :  { %v179_v40 = vadd.f32 %v570_v38, %v178_v39 }
 0x125   :  { %v182_v41 = vmax.f32 %v179_v40, 0.0 }
 0x127   :  { %v183_v42 = vpack.c.bf16 %v182_v41, %v182_v41 }
 0x129   :  { %262 = vmatmul.bf16.vlgmr.msra.gmra.mxu2 %v183_v42 }
 0x12a   :  { %v180_v43 = vpop.f32.mrf.mxu1 }
 0x1ac   :  { %v263_v47 = vpop.f32.mrf.mxu2 }
 0x1ad   :  { %v264_v48 = vadd.f32 %v571_v46, %v263_v47 }
 0x1af   :  { %v267_v49 = vmax.f32 %v264_v48, 0.0 }
 0x1b1   :  { %v268_v50 = vpack.c.bf16 %v267_v49, %v267_v49 }
 0x1b3   :  { %347 = vmatmul.bf16.vlgmr.msra.gmra.mxu3 %v268_v50 }
 0x1b4   :  { %v265_v51 = vpop.f32.mrf.mxu2 }
 0x236   :  { %v348_v53 = vpop.f32.mrf.mxu3 }
 0x237   :  { %v349_v54 = vadd.f32 %v572_v52, %v348_v53 }
 0x239   :  { %v352_v55 = vmax.f32 %v349_v54, 0.0 }
 0x23b   :  { %353 = vst [vmem:[%s710_s3] sm:$0xff] %v352_v55 }
 0x23e   :  { %v350_v56 = vpop.f32.mrf.mxu3 }

</bundles_post_ra>
